<compile_context>
chip_gen: v5e
topology: v5e:2x2
jax: 0.10.0
libtpu: 0.0.40
codegen_flags: <defaults>
</compile_context>

<pallas_src>
import jax
import jax.numpy as jnp
from jax.experimental import pallas as pl
from jax.experimental.pallas import tpu as pltpu  # noqa: F401  (TPU backend)


def _embed_kernel(x_ref, pos_ref, o_ref):
    # x_ref  : (B*C, N)  lane-dense NCHW rows (contiguous view of x.flatten(2))
    # pos_ref: (C, N)    lane-dense, pre-transposed position embeddings
    # o_ref  : (B*C, N)  lane-dense output (wrapper restores [B, N, C])
    reps = o_ref.shape[0] // pos_ref.shape[0]      # = B (static)
    pos = pos_ref[...]
    if reps > 1:
        # Replicate (C, N) along the sublane axis to (B*C, N): a tiny sublane
        # concat — no lane movement, no XLU transpose.
        pos = jnp.concatenate([pos] * reps, axis=0)
    o_ref[...] = x_ref[...] + pos                  # dense VPU add, dense store
    # TODO(synk): training-mode dropout (pltpu.prng_seed / prng_random_bits
    # mask with 1/(1-p) scaling) is not implemented; eval-mode semantics are exact.


def channel_embeddings(x_nchw, position_embeddings):
    """x_nchw: [B, C, H, W]; position_embeddings: [1, N, C] with N = H*W.

    Returns embeddings: [B, N, C] (same semantics as the PyTorch module in
    eval mode).
    """
    if x_nchw is None:      # mirrors the PyTorch `if x is None: return None`
        return None

    B, C, H, W = x_nchw.shape
    N = H * W
    assert position_embeddings.shape == (1, N, C)

    # Free, contiguous view: [B, C, H, W] -> [B*C, N]  (== x.flatten(2)).
    x_rows = x_nchw.reshape(B * C, N)
    # One-off 4 KiB layout prep: (1, N, C) -> (C, N), lane-dense.
    pos_cn = jnp.transpose(position_embeddings.reshape(N, C), (1, 0))

    itemsize = jnp.dtype(x_nchw.dtype).itemsize
    cost = pl.CostEstimate(
        flops=B * N * C,                                     # one add / element
        transcendentals=0,
        bytes_accessed=(2 * B * N * C + C * N) * itemsize,   # x + out + pos
    )

    out_rows = pl.pallas_call(
        _embed_kernel,
        out_shape=jax.ShapeDtypeStruct((B * C, N), x_nchw.dtype),
        # Single invocation (grid=()): full-array blocks (block == array dims
        # satisfies the (8,128) rule), everything resident in VMEM.
        in_specs=[
            pl.BlockSpec((B * C, N), lambda: (0, 0)),   # lane-dense x
            pl.BlockSpec((C, N), lambda: (0, 0)),       # lane-dense pos
        ],
        out_specs=pl.BlockSpec((B * C, N), lambda: (0, 0)),
        cost_estimate=cost,
    )(x_rows, pos_cn)

    # Restore the module's [B, N, C] layout. 8 KiB; XLA fuses this into the
    # consumer (or drop it entirely if the consumer accepts [B, C, N]).
    return jnp.transpose(out_rows.reshape(B, C, N), (0, 2, 1))


if __name__ == "__main__":
    # Module config: img_size = (16, 16), in_channels = 4  ->  N = 256
    B, C, H, W = 2, 4, 16, 16
    N = H * W

    key = jax.random.PRNGKey(0)
    kx, kp = jax.random.split(key)

    x = jax.random.normal(kx, (B, C, H, W), dtype=jnp.float32)
    # nn.Parameter(torch.zeros(1, N, C)) — initialized with small random values
    # here so the addition is non-trivial in the check.
    position_embeddings = 0.02 * jax.random.normal(kp, (1, N, C), dtype=jnp.float32)

    out = channel_embeddings(x, position_embeddings)
    out = jax.block_until_ready(out)

    # Reference (pure JAX) check of the forward semantics (eval mode).
    ref = jnp.transpose(x.reshape(B, C, N), (0, 2, 1)) + position_embeddings
    assert out.shape == (B, N, C)
    assert jnp.allclose(out, ref, atol=1e-6, rtol=1e-6)

    print("KERNEL_OK")
</pallas_src>

<mosaic_0001>
module attributes {stable_mosaic.version = 11 : i64} {
  func.func @_embed_kernel(%arg0: memref<8x256xf32, #tpu.memory_space<vmem>>, %arg1: memref<4x256xf32, #tpu.memory_space<vmem>>, %arg2: memref<8x256xf32, #tpu.memory_space<vmem>>) attributes {dimension_semantics = [], scalar_prefetch = 0 : i64, scratch_operands = 0 : i64, tpu.core_type = #tpu.core_type<tc>} {
    %c0 = arith.constant 0 : index
    %c0_0 = arith.constant 0 : index
    %0 = vector.load %arg1[%c0, %c0_0] : memref<4x256xf32, #tpu.memory_space<vmem>>, vector<4x256xf32>
    %1 = tpu.concatenate %0, %0 in 0 : vector<4x256xf32>, vector<4x256xf32> -> vector<8x256xf32>
    %c0_1 = arith.constant 0 : index
    %c0_2 = arith.constant 0 : index
    %2 = vector.load %arg0[%c0_1, %c0_2] : memref<8x256xf32, #tpu.memory_space<vmem>>, vector<8x256xf32>
    %3 = arith.addf %2, %1 : vector<8x256xf32>
    %c0_3 = arith.constant 0 : index
    %c0_4 = arith.constant 0 : index
    %4 = vector.load %arg2[%c0_3, %c0_4] : memref<8x256xf32, #tpu.memory_space<vmem>>, vector<8x256xf32>
    tpu.vector_store %arg2[%c0_3, %c0_4], %3 {strides = array<i32>} : memref<8x256xf32, #tpu.memory_space<vmem>>, vector<8x256xf32>,
    return
  }
}

</mosaic_0001>

<bundles_post_ra>
// kernel: tpu_custom_call.1
= control target key start
LH: loop header
LB: loop body
LE: loop exit
PB: predicated region body
PF: predicated region fallthrough
CT: control target
= control target key end

     0   :  { %7 = vsyncpa [#allocation3], 0  ;;  %s188_s0 = inlined_call_operand.hbm [shape: f32[8,256], index: 0, kind: input, shape index: {}]   ;;  %s189_s1 = inlined_call_operand.hbm [shape: f32[4,256], index: 1, kind: input, shape index: {}]   ;;  %s190_s2 = inlined_call_operand.hbm [shape: f32[8,256], index: 2, kind: output, shape index: {}]  }
   0x1   :  { %8 = vsyncpa [#allocation6], 0 }
   0x2   :  { %9 = vsyncpa [#allocation4], 0  ;;  %s15_s11 = sshll.u32 %s188_s0, 4  ;;  %s161_s12 = smov [#allocation2]   ;;  %s16_s11 = int_to_ptr.hbm [resolvable:$true] %s15_s11 }
   0x3   :  { %s17_s13 = sshll.u32 %s161_s12, 4  ;;  %s26_s16 = sshll.u32 %s189_s1, 4  ;;  %s18_s13 = int_to_ptr.vmem [resolvable:$true] %s17_s13  ;;  %s27_s16 = int_to_ptr.hbm [resolvable:$true] %s26_s16 }
   0x4   :  { %20 = dma.hbm_to_vmem [thread:$0]  %s16_s11, 256, %s18_s13, [#allocation3]  }
   0x5   :  { %s162_s17 = smov [#allocation5]  }
   0x6   :  { %s28_s18 = sshll.u32 %s162_s17, 4  ;;  %s29_s18 = int_to_ptr.vmem [resolvable:$true] %s28_s18 }
   0x7   :  { %31 = dma.hbm_to_vmem [thread:$0]  %s27_s16, 128, %s29_s18, [#allocation6]  }
   0x8   :  { %155 = dma.done.wait [#allocation3], 256  }
   0x9   :  { %156 = vsyncadd [#allocation3], 4294967040 }
   0xa   :  { %157 = dma.done.wait [#allocation6], 128  }
   0xb   :  { %158 = vsyncadd [#allocation6], 4294967168  ;;  %v40_v0 = vld [vmem:[#allocation5] sm:$0xff]  ;;  %vm53_vm0 = vcmask 1043456   ;;  %v56_v3 = vld [vmem:[#allocation2] sm:$0xff]  ;;  %s163_s0 = smov [#allocation7]  }
   0xc   :  { %42 = vst [vmem:[#allocation1] ss:$2 sm:$0xff] %v40_v0  ;;  %v57_v4 = vld [vmem:[#allocation2 + $0x8] sm:$0xff]  ;;  %s67_s1 = sshll.u32 %s163_s0, 4  ;;  %s69_s21 = sshll.u32 %s190_s2, 4  ;;  %s68_s1 = int_to_ptr.vmem [resolvable:$true] %s67_s1  ;;  %s70_s21 = int_to_ptr.hbm [resolvable:$true] %s69_s21 }
  0x13   :  { %v43_v1 = vld.sshfl [vmem:[#allocation1] sm:$0xff pattern:$0x75316420]  ;;  %v44_v2 = vld.sshfl [vmem:[#allocation1 + $0x8] sm:$0xff pattern:$0x75316420] }
  0x14   :  { %48 = vst [vmem:[#allocation1 + $0x1] ss:$2 sm:$0xff] %v40_v0 }
  0x1b   :  { %v49_v5 = vld.sshfl [vmem:[#allocation1] sm:$0xff pattern:$0x75316420]  ;;  %v50_v6 = vld.sshfl [vmem:[#allocation1 + $0x8] sm:$0xff pattern:$0x75316420] }
  0x1c   :  { %v54_v7 = vsel %vm53_vm0, %v43_v1, %v49_v5  ;;  %v55_v8 = vsel %vm53_vm0, %v44_v2, %v50_v6 }
  0x1d   :  { %v58_v9 = vadd.f32 %v56_v3, %v54_v7  ;;  %v59_v10 = vadd.f32 %v57_v4, %v55_v8 }
  0x1f   :  { %60 = vst [vmem:[#allocation7] sm:$0xff] %v58_v9 }
  0x20   :  { %61 = vst [vmem:[#allocation7 + $0x8] sm:$0xff] %v59_v10 }
  0x21   :  { %72 = dma.vmem_to_hbm [thread:$0]  %s68_s1, 256, %s70_s21, [#allocation4]  }
  0x22   :  { %159 = dma.done.wait [#allocation4], 256  }
  0x23   :  { %160 = vsyncadd [#allocation4], 4294967040 }
  0x24   :  { %77 = vsyncpa [#allocation3], 1 }
  0x25   :  { %78 = vsyncpa [#allocation6], 1 }
  0x26   :  { %79 = vsyncpa [#allocation4], 1 }

</bundles_post_ra>
